<compile_context>
chip_gen: v7x
topology: tpu7x:2x2x1
jax: 0.10.0
libtpu: 0.0.40
codegen_flags: <defaults>
</compile_context>

<pallas_src>
import math
import functools

import jax
import jax.numpy as jnp
from jax.experimental import pallas as pl
from jax.experimental.pallas import tpu as pltpu


def _cdiv(a, b):
    return (a + b - 1) // b


def _round_up(x, m):
    return ((x + m - 1) // m) * m


def _linear_relu_kernel(x_ref, w_ref, b_ref, o_ref, *scratch):
    # x_ref: (bm, bk)  w_ref: (bk, bn)  b_ref: (1, bn) f32  o_ref: (bm, bn)
    # K is the innermost (reduction) grid axis; output block is resident.
    acc_ref = scratch[0] if scratch else o_ref   # f32 out -> accumulate in place
    k = pl.program_id(2)

    @pl.when(k == 0)
    def _():
        acc_ref[...] = jnp.zeros_like(acc_ref)

    acc_ref[...] += jnp.dot(
        x_ref[...], w_ref[...], preferred_element_type=jnp.float32
    )

    @pl.when(k == pl.num_programs(2) - 1)
    def _():
        o_ref[...] = jnp.maximum(acc_ref[...] + b_ref[...], 0.0).astype(o_ref.dtype)


def prepare_params(weight, bias, *, compute_dtype=jnp.bfloat16, block_k=512):
    """One-time parameter prep (do this at init, NOT per call).

    weight: (N, K) PyTorch nn.Linear layout  ->  returns K-major (Kp, N) in
    `compute_dtype` (zero-padded along K only if K > block_k and K % 128 != 0)
    plus an f32 (1, N) bias.
    """
    N, K = weight.shape
    w_t = weight.T.astype(compute_dtype)                      # (K, N), K-major
    if K > block_k and K % 128 != 0:
        Kp = _round_up(K, 128)
        w_t = jnp.pad(w_t, ((0, Kp - K), (0, 0)))             # zeros: safe in dot
    bias2d = bias.reshape(1, N).astype(jnp.float32)
    return w_t, bias2d


@functools.partial(jax.jit, static_argnames=("block_m", "block_n", "block_k"))
def fused_linear_relu(x, w_t, bias2d, *, block_m=512, block_n=512, block_k=512):
    """relu(x @ W^T + b) with W supplied K-major as w_t=(Kw, N) (see prepare_params).

    x: (B, K) float.  Output: (B, N) in x.dtype.  Compute dtype = w_t.dtype,
    accumulation always f32.
    """
    B, K = x.shape
    Kw, N = w_t.shape
    assert Kw >= K, "weight K dim smaller than x K dim"
    assert bias2d.shape == (1, N)

    out_dtype = x.dtype
    compute_dtype = w_t.dtype
    if x.dtype != compute_dtype:
        x = x.astype(compute_dtype)
    if Kw > K:
        # Reduction axis must be zero-padded for correctness (weight already is).
        x = jnp.pad(x, ((0, 0), (0, Kw - K)))

    x_item = jnp.dtype(compute_dtype).itemsize
    w_item = x_item
    out_item = jnp.dtype(out_dtype).itemsize

    # ---- tile selection --------------------------------------------------
    sub = max(8, 32 // x_item)                  # sublane packing: f32=8, bf16=16
    bm = min(block_m, _round_up(B, sub))
    bn = min(block_n, _round_up(N, 128))        # lane-dense output

    if Kw <= block_k:
        bk = Kw                                 # single K step, full-dim blocks
    else:
        if Kw % 128 != 0:                       # un-prepared weight: pad K here
            Kp = _round_up(Kw, 128)
            w_t = jnp.pad(w_t, ((0, Kp - Kw), (0, 0)))
            x = jnp.pad(x, ((0, 0), (0, Kp - Kw)))
            Kw = Kp
        bk = 128
        for cand in range((min(block_k, Kw) // 128) * 128, 127, -128):
            if Kw % cand == 0:                  # bk must divide Kw (no garbage K)
                bk = cand
                break

    grid_m = _cdiv(B, bm)
    grid_n = _cdiv(N, bn)
    # v7x: 2 TensorCores share the "parallel" axes -> keep >= 2 parallel blocks.
    if grid_m * grid_n < 2 and N > 128:
        bn = max(128, _round_up(_cdiv(N, 2), 128))
        grid_n = _cdiv(N, bn)
    grid_k = Kw // bk
    grid = (grid_m, grid_n, grid_k)

    # f32 outputs accumulate directly into the resident output block.
    use_scratch = jnp.dtype(out_dtype) != jnp.dtype(jnp.float32)
    scratch_shapes = [pltpu.VMEM((bm, bn), jnp.float32)] if use_scratch else []

    # Explicit VMEM budget: double-buffered x/W/bias/out tiles (+ f32 acc),
    # capped at 64 MiB so the same numbers are valid on v7x.
    footprint = (2 * (bm * bk * x_item + bk * bn * w_item + bn * 4)
                 + 2 * bm * bn * out_item
                 + (bm * bn * 4 if use_scratch else 0))
    vmem_limit = int(min(64 * 1024 * 1024, max(2 * footprint, 32 * 1024 * 1024)))

    cost = pl.CostEstimate(
        flops=2 * B * N * Kw,
        transcendentals=0,
        bytes_accessed=(grid_n * B * Kw * x_item      # x streamed once per N tile
                        + grid_m * Kw * N * w_item    # W streamed once per M tile
                        + grid_m * N * 4              # bias
                        + B * N * out_item),          # output written once
    )

    out = pl.pallas_call(
        _linear_relu_kernel,
        out_shape=jax.ShapeDtypeStruct((B, N), out_dtype),
        grid_spec=pltpu.PrefetchScalarGridSpec(
            num_scalar_prefetch=0,
            grid=grid,
            in_specs=[
                pl.BlockSpec((bm, bk), lambda i, j, k: (i, k)),   # x tile
                pl.BlockSpec((bk, bn), lambda i, j, k: (k, j)),   # W^T tile (K-major)
                pl.BlockSpec((1, bn), lambda i, j, k: (0, j)),    # bias tile
            ],
            out_specs=pl.BlockSpec((bm, bn), lambda i, j, k: (i, j)),
            scratch_shapes=scratch_shapes,
        ),
        compiler_params=pltpu.CompilerParams(
            dimension_semantics=("parallel", "parallel", "arbitrary"),
            vmem_limit_bytes=vmem_limit,
        ),
        cost_estimate=cost,
    )(x, w_t, bias2d)

    return out


def init_params(key, in_features, out_features):
    """Deterministic init matching PyTorch's kaiming_uniform_(a=sqrt(5)) scheme."""
    kw, kb = jax.random.split(key)
    bound = 1.0 / math.sqrt(in_features)
    weight = jax.random.uniform(
        kw, (out_features, in_features), jnp.float32, -bound, bound)
    bias = jax.random.uniform(kb, (out_features,), jnp.float32, -bound, bound)
    return weight, bias


if __name__ == "__main__":
    key = jax.random.PRNGKey(0)
    k_x, k_p = jax.random.split(key)

    batch, in_features, out_features = 8, 32, 64
    x = jax.random.normal(k_x, (batch, in_features), jnp.float32)
    weight, bias = init_params(k_p, in_features, out_features)

    # Plain-JAX reference (matches the PyTorch module).
    ref = jnp.maximum(x @ weight.T + bias, 0.0)

    # Default fast path: bf16 operands, f32 accumulate + epilogue.
    w_t_bf16, b2 = prepare_params(weight, bias)                       # one-time
    out = jax.block_until_ready(fused_linear_relu(x, w_t_bf16, b2))
    assert out.shape == (batch, out_features) and out.dtype == jnp.float32
    assert jnp.allclose(out, ref, atol=3e-2, rtol=3e-2), "bf16 path mismatch"

    # Exact-f32 path (bitwise-faithful to the reference semantics).
    w_t_f32, b2_f32 = prepare_params(weight, bias, compute_dtype=jnp.float32)
    out32 = jax.block_until_ready(fused_linear_relu(x, w_t_f32, b2_f32))
    assert jnp.allclose(out32, ref, atol=1e-5, rtol=1e-5), "f32 path mismatch"

    print("KERNEL_OK")
</pallas_src>

<mosaic_0001>
module attributes {stable_mosaic.version = 11 : i64} {
  func.func @_linear_relu_kernel(%arg0: i32, %arg1: i32, %arg2: i32, %arg3: memref<16x32xbf16, #tpu.memory_space<vmem>>, %arg4: memref<32x128xbf16, #tpu.memory_space<vmem>>, %arg5: memref<1x128xf32, #tpu.memory_space<vmem>>, %arg6: memref<16x128xf32, #tpu.memory_space<vmem>>) attributes {dimension_semantics = [#tpu.dimension_semantics<parallel>, #tpu.dimension_semantics<parallel>, #tpu.dimension_semantics<arbitrary>], iteration_bounds = array<i64: 1, 1, 1>, scalar_prefetch = 0 : i64, scratch_operands = 0 : i64, tpu.core_type = #tpu.core_type<tc>, window_params = [{transform_indices = @transform_0, window_bounds = array<i64: 16, 32>}, {transform_indices = @transform_1, window_bounds = array<i64: 32, 128>}, {transform_indices = @transform_2, window_bounds = array<i64: 1, 128>}, {transform_indices = @transform_3, window_bounds = array<i64: 16, 128>}]} {
    %c0_i32 = arith.constant 0 : i32
    %0 = arith.cmpi eq, %arg2, %c0_i32 : i32
    %1 = arith.extui %0 : i1 to i32
    %c0_i32_0 = arith.constant 0 : i32
    %2 = arith.cmpi ne, %1, %c0_i32_0 : i32
    scf.if %2 {
      %cst_10 = arith.constant 0.000000e+00 : f32
      %12 = vector.broadcast %cst_10 : f32 to vector<16x128xf32>
      %c0_11 = arith.constant 0 : index
      %c0_12 = arith.constant 0 : index
      %13 = vector.load %arg6[%c0_11, %c0_12] : memref<16x128xf32, #tpu.memory_space<vmem>>, vector<16x128xf32>
      tpu.vector_store %arg6[%c0_11, %c0_12], %12 {strides = array<i32>} : memref<16x128xf32, #tpu.memory_space<vmem>>, vector<16x128xf32>,
    } else {
    }
    %c0 = arith.constant 0 : index
    %c0_1 = arith.constant 0 : index
    %3 = vector.load %arg6[%c0, %c0_1] : memref<16x128xf32, #tpu.memory_space<vmem>>, vector<16x128xf32>
    %c0_2 = arith.constant 0 : index
    %c0_3 = arith.constant 0 : index
    %4 = vector.load %arg3[%c0_2, %c0_3] : memref<16x32xbf16, #tpu.memory_space<vmem>>, vector<16x32xbf16>
    %c0_4 = arith.constant 0 : index
    %c0_5 = arith.constant 0 : index
    %5 = vector.load %arg4[%c0_4, %c0_5] : memref<32x128xbf16, #tpu.memory_space<vmem>>, vector<32x128xbf16>
    %cst = arith.constant dense<0.000000e+00> : vector<16x128xf32>
    %6 = tpu.matmul %4, %5, %cst {dimension_numbers = #tpu.dot_dimension_numbers<[1], [0], [0], [1], [0, 0, 1, 1], [], []>} : vector<16x32xbf16>, vector<32x128xbf16>, vector<16x128xf32> -> vector<16x128xf32>
    %7 = arith.addf %3, %6 : vector<16x128xf32>
    %c0_6 = arith.constant 0 : index
    %c0_7 = arith.constant 0 : index
    %8 = vector.load %arg6[%c0_6, %c0_7] : memref<16x128xf32, #tpu.memory_space<vmem>>, vector<16x128xf32>
    tpu.vector_store %arg6[%c0_6, %c0_7], %7 {strides = array<i32>} : memref<16x128xf32, #tpu.memory_space<vmem>>, vector<16x128xf32>,
    %c0_i32_8 = arith.constant 0 : i32
    %9 = arith.cmpi eq, %arg2, %c0_i32_8 : i32
    %10 = arith.extui %9 : i1 to i32
    %c0_i32_9 = arith.constant 0 : i32
    %11 = arith.cmpi ne, %10, %c0_i32_9 : i32
    scf.if %11 {
      %c0_10 = arith.constant 0 : index
      %c0_11 = arith.constant 0 : index
      %12 = vector.load %arg6[%c0_10, %c0_11] : memref<16x128xf32, #tpu.memory_space<vmem>>, vector<16x128xf32>
      %c0_12 = arith.constant 0 : index
      %c0_13 = arith.constant 0 : index
      %13 = vector.load %arg5[%c0_12, %c0_13] : memref<1x128xf32, #tpu.memory_space<vmem>>, vector<1x128xf32>
      %14 = vector.broadcast %13 : vector<1x128xf32> to vector<16x128xf32>
      %15 = arith.addf %12, %14 : vector<16x128xf32>
      %cst_14 = arith.constant 0.000000e+00 : f32
      %16 = vector.broadcast %cst_14 : f32 to vector<16x128xf32>
      %17 = arith.maximumf %15, %16 : vector<16x128xf32>
      %c0_15 = arith.constant 0 : index
      %c0_16 = arith.constant 0 : index
      %18 = vector.load %arg6[%c0_15, %c0_16] : memref<16x128xf32, #tpu.memory_space<vmem>>, vector<16x128xf32>
      tpu.vector_store %arg6[%c0_15, %c0_16], %17 {strides = array<i32>} : memref<16x128xf32, #tpu.memory_space<vmem>>, vector<16x128xf32>,
    } else {
    }
    return
  }
  func.func @transform_0(%arg0: i32, %arg1: i32, %arg2: i32) -> (i32, i32) {
    %c0_i32 = arith.constant 0 : i32
    return %arg0, %arg2 : i32, i32
  }
  func.func @transform_1(%arg0: i32, %arg1: i32, %arg2: i32) -> (i32, i32) {
    %c0_i32 = arith.constant 0 : i32
    return %arg2, %arg1 : i32, i32
  }
  func.func @transform_2(%arg0: i32, %arg1: i32, %arg2: i32) -> (i32, i32) {
    %c0_i32 = arith.constant 0 : i32
    %c0_i32_0 = arith.constant 0 : i32
    return %c0_i32, %arg1 : i32, i32
  }
  func.func @transform_3(%arg0: i32, %arg1: i32, %arg2: i32) -> (i32, i32) {
    %c0_i32 = arith.constant 0 : i32
    return %arg0, %arg1 : i32, i32
  }
}

</mosaic_0001>

<bundles_post_ra>
// kernel: fused_linear_relu.1
= control target key start
LH: loop header
LB: loop body
LE: loop exit
PB: predicated region body
PF: predicated region fallthrough
CT: control target
= control target key end

     0   :  { %8 = vsyncpa [#allocation3], 0  ;;  %s278_s0 = inlined_call_operand.vmem [shape: bf16[8,32], index: 0, kind: input, shape index: {}]   ;;  %s279_s1 = inlined_call_operand.hbm [shape: bf16[32,64], index: 1, kind: input, shape index: {}]   ;;  %s280_s2 = inlined_call_operand.vmem [shape: f32[1,64], index: 2, kind: input, shape index: {}]   ;;  %s281_s3 = inlined_call_operand.hbm [shape: f32[8,64], index: 3, kind: output, shape index: {}]  }
   0x1   :  { %9 = vsyncpa [#allocation4], 0  ;;  %s220_s12 = smov [#allocation2]   ;;  %s172_s16 = scalar_lea.hbm %s279_s1, 256 }
   0x2   :  { %s17_s13 = sshll.u32 %s220_s12, 4  ;;  %p173_p0 = scmp.ne.s32.totalorder %s279_s1, %s172_s16  ;;  %s18_s13 = int_to_ptr.vmem [resolvable:$true] %s17_s13 }
   0x3   :  { %p176_p1 = scmp.lt.u32.totalorder %s172_s16, %s279_s1 }
   0x5   :  { %p178_p2 = pnand %p176_p1, %p173_p0 }
   0x7   :  { %181 = shalt.err (!%p178_p2)
}
   0x8   :  { %s182_s21 = scalar_lea.vmem %s18_s13, 256  ;;  %p187_p4 = scmp.lt.s32.totalorder %s18_s13, %s18_s13 }
   0x9   :  { %p183_p3 = scmp.ne.s32.totalorder %s18_s13, %s182_s21  ;;  %p188_p5 = scmp.lt.s32.totalorder %s182_s21, %s182_s21 }
   0xb   :  { %p189_p6 = por %p188_p5, %p187_p4 }
   0xd   :  { %p190_p7 = pnand %p189_p6, %p183_p3 }
   0xf   :  { %193 = shalt.err (!%p190_p7)
}
  0x10   :  { %s221_s22 = smov 64   ;;  %s222_s23 = smov 4  }
  0x11   :  { %23 = dma.hbm_to_vmem [thread:$0]  %s279_s1, 256, %s18_s13, [#allocation3], %s221_s22, %s221_s22, %s222_s23  }
  0x12   :  { %216 = dma.done.wait [#allocation3], 256  }
  0x13   :  { %217 = vsyncadd [#allocation3], 4294967040  ;;  %v223_v0 = vmov 0.0   ;;  %vm224_vm0 = vmmov 0   ;;  %v169_v1 = vld [vmem:[#allocation2] sm:$0xff]   ;;  %v170_v2 = vld [vmem:[#allocation2 + $0x8] sm:$0xff]  }
  0x14   :  { %153 = vmatprep.subr.bf16.mxu0 %v223_v0  ;;  %157 = vmatprep.mubr.msk.bf16.mxu0 %vm224_vm0, %v223_v0  ;;  %v171_v3 = vld [vmem:[%s278_s0] sm:$0xff]   ;;  %vm61_vm1 = vcmask 261120  }
  0x15   :  { %154 = vmatpush3.bf16.msra.mxu0 %v169_v1  ;;  %v149_v5 = vld [vmem:[%s280_s2] ss:$0 sm:$0xff] }
  0x16   :  { %155 = vmatprep.subr.bf16.mxu0 %v223_v0 }
  0x19   :  { %156 = vmatpush3.bf16.msra.mxu0 %v170_v2 }
  0x1c   :  { %158 = vmatmul.mubr.msk.bf16.vlgmr.msra.gmra.mrb[0].mxu0 %vm61_vm1, %v171_v3 }
  0xef   :  { %v99_v4 = vpop.f32.mrb[0].mxu0 }
  0xf0   :  { %v159_v6 = vpop.f32.mrb[1].mxu0  ;;  %v122_v8 = vadd.f32 %v149_v5, %v99_v4 }
  0xf1   :  { %v102_v7 = vpop.f32.mrb[2].mxu0 }
  0xf2   :  { %v160_v9 = vpop.f32.mrb[3].mxu0  ;;  %v124_v10 = vmax.f32 %v122_v8, 0.0  ;;  %v123_v11 = vadd.f32 %v149_v5, %v102_v7 }
  0xf4   :  { %126 = vst [vmem:[#allocation5] sm:$0xff] %v124_v10  ;;  %v125_v12 = vmax.f32 %v123_v11, 0.0 }
  0xf6   :  { %127 = vst [vmem:[#allocation5 + $0x8] sm:$0xff] %v125_v12 }
  0xf7   :  { %132 = vsyncadd [#allocation4], 128  ;;  %s225_s29 = smov [#allocation5]  }
  0xf8   :  { %s133_s0 = sshll.u32 %s225_s29, 4  ;;  %s134_s0 = int_to_ptr.vmem [resolvable:$true] %s133_s0 }
  0xf9   :  { %s194_s30 = scalar_lea.vmem %s134_s0, 128  ;;  %s198_s4 = scalar_lea.vmem %s134_s0, 256 }
  0xfa   :  { %p195_p8 = scmp.ne.s32.totalorder %s134_s0, %s194_s30  ;;  %p199_p9 = scmp.lt.s32.totalorder %s134_s0, %s134_s0 }
  0xfb   :  { %p200_p10 = scmp.lt.s32.totalorder %s198_s4, %s194_s30 }
  0xfd   :  { %p201_p11 = por %p200_p10, %p199_p9 }
  0xff   :  { %p202_p12 = pnand %p201_p11, %p195_p8 }
 0x101   :  { %205 = shalt.err (!%p202_p12)
}
 0x102   :  { %s206_s6 = scalar_lea.hbm %s281_s3, 128 }
 0x103   :  { %p207_p13 = scmp.ne.s32.totalorder %s281_s3, %s206_s6  ;;  %p210_p0 = scmp.lt.u32.totalorder %s206_s6, %s281_s3 }
 0x105   :  { %p212_p1 = pnand %p210_p0, %p207_p13 }
 0x107   :  { %215 = shalt.err (!%p212_p1)
}
 0x108   :  { %s226_s11 = smov 128   ;;  %s227_s12 = smov 8  }
 0x109   :  { %139 = dma.vmem_to_hbm [thread:$0]  %s134_s0, 128, %s281_s3, [#allocation4], %s226_s11, %s226_s11, %s227_s12  }
 0x10a   :  { %218 = dma.done.wait [#allocation4], 256  }
 0x10b   :  { %219 = vsyncadd [#allocation4], 4294967040 }
 0x10c   :  { %143 = vsyncpa [#allocation3], 1 }
 0x10d   :  { %144 = vsyncpa [#allocation4], 1 }

</bundles_post_ra>
